<compile_context>
chip_gen: v5e
topology: v5e:2x2
jax: 0.10.0
libtpu: 0.0.40
codegen_flags: <defaults>
</compile_context>

<pallas_src>
import math

import jax
import jax.numpy as jnp
from jax.experimental import pallas as pl
from jax.experimental.pallas import tpu as pltpu


def _round_up(a, m):
    return ((a + m - 1) // m) * m


def _broadcast_pe_kernel(pe_ref, o_ref):
    """Fill the output row block with copies of the resident PE row.

    pe_ref: (8, TDp) VMEM block, every sublane row is the same flattened PE row
            (pre-replicated in the wrapper). Constant index_map -> resident.
    o_ref:  (rows_per_block, TDp) output block; every row gets the PE row.
    """
    rows, cols = o_ref.shape
    sub = pe_ref.shape[0]
    if rows <= sub:
        # Full-array block (BN <= 8): take the first `rows` replicated rows.
        o_ref[...] = pe_ref[:rows, :]
    else:
        # rows is guaranteed to be a multiple of `sub` (8) by the wrapper.
        reps = rows // sub
        o_ref[...] = jnp.broadcast_to(
            pe_ref[...][None, :, :], (reps, sub, cols)
        ).reshape(rows, cols)


def _make_pe_table(embed_dim, max_len=100):
    """Sinusoidal table identical to the PyTorch __init__ buffer, (max_len, D)."""
    assert embed_dim % 2 == 0, "embed_dim must be even (as in the PyTorch module)"
    position = jnp.arange(max_len, dtype=jnp.float32)[:, None]
    div_term = jnp.exp(
        jnp.arange(0, embed_dim, 2, dtype=jnp.float32)
        * (-math.log(10000.0) / embed_dim)
    )
    pe = jnp.zeros((max_len, embed_dim), jnp.float32)
    pe = pe.at[:, 0::2].set(jnp.sin(position * div_term))
    pe = pe.at[:, 1::2].set(jnp.cos(position * div_term))
    return pe


def _chip_tuning():
    """Best-effort generation detection -> (num_tensorcores, block_cap, vmem_limit)."""
    kind = ""
    try:
        kind = jax.devices()[0].device_kind.lower()
    except Exception:
        pass
    if "v7" in kind:
        # 2 TCs/chip, 64 MiB VMEM/TC, ~3.2 TB/s: bigger blocks, even block count.
        return 2, 16 * 1024 * 1024, 48 * 1024 * 1024
    # v5e / v6e: single TC, ~4 MiB blocks already sit at ~86% of HBM roofline.
    return 1, 4 * 1024 * 1024, 32 * 1024 * 1024


def positional_encoding(x, max_len=100, min_pallas_bytes=1 << 20):
    """Pallas equivalent of PositionalEncoding.forward(x).

    x: (B, N, T, D) array; only its shape matters. Returns float32 (B, N, T, D).
    """
    B, N, T, D = x.shape
    assert T <= max_len, "sequence length exceeds max_len"

    # Precompute the buffer once (mirrors __init__).
    pe = _make_pe_table(D, max_len)[:T]  # (T, D) float32

    # Tiny outputs: plain XLA broadcast is faster than any kernel launch.
    if B * N * T * D * 4 < min_pallas_bytes:
        return jnp.broadcast_to(pe[None, None, :, :], (B, N, T, D))

    BN = B * N
    TD = T * D
    TDp = _round_up(TD, 128)  # lane-dense output width (unmasked vst)

    pe_flat = pe.reshape(1, TD)
    if TDp != TD:
        pe_flat = jnp.pad(pe_flat, ((0, 0), (0, TDp - TD)))
    # Pre-replicate across 8 sublanes (free: a (1, TDp) f32 block pads to 8
    # sublanes in VMEM anyway); removes the per-step sublane broadcast.
    pe_block = jnp.broadcast_to(pe_flat, (8, TDp))

    num_tc, block_cap_bytes, vmem_limit = _chip_tuning()
    row_bytes = TDp * 4

    if BN <= 8:
        rows_per_block = BN  # block must equal the full dim when < 8
    else:
        cap_rows = max(8, ((block_cap_bytes // row_bytes) // 8) * 8)
        rows_per_block = max(8, min((BN // 8) * 8, cap_rows))
    num_blocks = -(-BN // rows_per_block)

    # On a 2-TC chip, make the ("parallel",) grid split evenly across cores.
    if num_tc == 2 and BN >= 16:
        if num_blocks == 1:
            rows_per_block = max(8, _round_up(-(-BN // 2), 8))
        elif num_blocks % 2 == 1:
            rows_per_block = max(8, _round_up(-(-BN // (num_blocks + 1)), 8))
        num_blocks = -(-BN // rows_per_block)

    cost = pl.CostEstimate(
        flops=0,
        transcendentals=0,
        bytes_accessed=BN * TDp * 4 + 8 * TDp * 4,
    )

    out_flat = pl.pallas_call(
        _broadcast_pe_kernel,
        out_shape=jax.ShapeDtypeStruct((BN, TDp), jnp.float32),
        grid=(num_blocks,),
        in_specs=[pl.BlockSpec((8, TDp), lambda i: (0, 0))],
        out_specs=pl.BlockSpec((rows_per_block, TDp), lambda i: (i, 0)),
        compiler_params=pltpu.CompilerParams(
            dimension_semantics=("parallel",),
            vmem_limit_bytes=vmem_limit,
        ),
        cost_estimate=cost,
    )(pe_block)

    # Free layout plumbing back to the original (B, N, T, D) view.
    if TDp != TD:
        out_flat = out_flat[:, :TD]
    return out_flat.reshape(B, N, T, D)


def _reference(x, max_len=100):
    """Plain-JAX reference mirroring the PyTorch module."""
    B, N, T, D = x.shape
    pe = _make_pe_table(D, max_len)
    return jnp.broadcast_to(pe[None, None, :T, :], (B, N, T, D))


if __name__ == "__main__":
    key = jax.random.PRNGKey(0)

    # Case 1: small canonical shape -> short-circuit path (pure XLA broadcast).
    B, N, T, D = 2, 4, 8, 32  # batch, nodes, seq_len, embed_dim
    x_small = jax.random.normal(key, (B, N, T, D), dtype=jnp.float32)
    out_small = jax.block_until_ready(positional_encoding(x_small))
    ref_small = _reference(x_small)
    assert out_small.shape == x_small.shape
    assert out_small.dtype == jnp.float32
    assert jnp.allclose(out_small, ref_small, atol=1e-5, rtol=1e-5)

    # Case 2: same shape forced through the Pallas kernel path.
    out_k = jax.block_until_ready(positional_encoding(x_small, min_pallas_bytes=0))
    assert out_k.shape == x_small.shape and out_k.dtype == jnp.float32
    assert jnp.allclose(out_k, ref_small, atol=1e-5, rtol=1e-5)

    # Case 3: ragged shape (B*N=21 not a multiple of 8, T*D=60 not a multiple
    # of 128) forced through the kernel: exercises lane padding + partial block.
    x_rag = jax.random.normal(key, (3, 7, 5, 12), dtype=jnp.float32)
    out_rag = jax.block_until_ready(positional_encoding(x_rag, min_pallas_bytes=0))
    assert out_rag.shape == x_rag.shape and out_rag.dtype == jnp.float32
    assert jnp.allclose(out_rag, _reference(x_rag), atol=1e-5, rtol=1e-5)

    print("KERNEL_OK")
</pallas_src>

<mosaic_0001>
module attributes {stable_mosaic.version = 11 : i64} {
  func.func @_broadcast_pe_kernel(%arg0: i32, %arg1: memref<8x256xf32, #tpu.memory_space<vmem>>, %arg2: memref<8x256xf32, #tpu.memory_space<vmem>>) attributes {dimension_semantics = [#tpu.dimension_semantics<parallel>], iteration_bounds = array<i64: 1>, scalar_prefetch = 0 : i64, scratch_operands = 0 : i64, tpu.core_type = #tpu.core_type<tc>, window_params = [{pipeline_mode = #tpu.pipeline_mode<synchronous>, transform_indices = @transform_0, window_bounds = array<i64: 8, 256>}, {transform_indices = @transform_1, window_bounds = array<i64: 8, 256>}]} {
    %c0 = arith.constant 0 : index
    %c0_0 = arith.constant 0 : index
    %0 = vector.load %arg1[%c0, %c0_0] : memref<8x256xf32, #tpu.memory_space<vmem>>, vector<8x256xf32>
    %c0_1 = arith.constant 0 : index
    %c0_2 = arith.constant 0 : index
    %1 = vector.load %arg2[%c0_1, %c0_2] : memref<8x256xf32, #tpu.memory_space<vmem>>, vector<8x256xf32>
    tpu.vector_store %arg2[%c0_1, %c0_2], %0 {strides = array<i32>} : memref<8x256xf32, #tpu.memory_space<vmem>>, vector<8x256xf32>,
    return
  }
  func.func @transform_0(%arg0: i32) -> (i32, i32) {
    %c0_i32 = arith.constant 0 : i32
    %c0_i32_0 = arith.constant 0 : i32
    %c0_i32_1 = arith.constant 0 : i32
    return %c0_i32, %c0_i32_0 : i32, i32
  }
  func.func @transform_1(%arg0: i32) -> (i32, i32) {
    %c0_i32 = arith.constant 0 : i32
    %c0_i32_0 = arith.constant 0 : i32
    return %arg0, %c0_i32 : i32, i32
  }
}

</mosaic_0001>

<bundles_post_ra>
// kernel: tpu_custom_call.1
= control target key start
LH: loop header
LB: loop body
LE: loop exit
PB: predicated region body
PF: predicated region fallthrough
CT: control target
= control target key end

     0   :  { %6 = vsyncpa [#allocation3], 0  ;;  %s116_s0 = inlined_call_operand.hbm [shape: f32[8,256], index: 0, kind: input, shape index: {}]   ;;  %s117_s1 = inlined_call_operand.hbm [shape: f32[8,256], index: 1, kind: output, shape index: {}]  }
   0x1   :  { %7 = vsyncpa [#allocation4], 0  ;;  %s13_s8 = sshll.u32 %s116_s0, 4  ;;  %s98_s9 = smov [#allocation2]   ;;  %s14_s8 = int_to_ptr.hbm [resolvable:$true] %s13_s8 }
   0x2   :  { %s15_s10 = sshll.u32 %s98_s9, 4  ;;  %s16_s10 = int_to_ptr.vmem [resolvable:$true] %s15_s10 }
   0x3   :  { %18 = dma.hbm_to_vmem [thread:$0]  %s14_s8, 256, %s16_s10, [#allocation3]  }
   0x4   :  { %94 = dma.done.wait [#allocation3], 256  }
   0x5   :  { %95 = vsyncadd [#allocation3], 4294967040  ;;  %s99_s11 = smov [#allocation5]   ;;  %s34_s15 = sshll.u32 %s117_s1, 4  ;;  %v23_v0 = vld [vmem:[#allocation2] sm:$0xff]  ;;  %v24_v1 = vld [vmem:[#allocation2 + $0x8] sm:$0xff]  ;;  %s35_s15 = int_to_ptr.hbm [resolvable:$true] %s34_s15 }
   0x6   :  { %s32_s12 = sshll.u32 %s99_s11, 4  ;;  %25 = vst [vmem:[#allocation5] sm:$0xff] %v23_v0  ;;  %s33_s12 = int_to_ptr.vmem [resolvable:$true] %s32_s12 }
   0x7   :  { %26 = vst [vmem:[#allocation5 + $0x8] sm:$0xff] %v24_v1 }
   0x8   :  { %37 = dma.vmem_to_hbm [thread:$0]  %s33_s12, 256, %s35_s15, [#allocation4]  }
   0x9   :  { %96 = dma.done.wait [#allocation4], 256  }
   0xa   :  { %97 = vsyncadd [#allocation4], 4294967040 }
   0xb   :  { %42 = vsyncpa [#allocation3], 1 }
   0xc   :  { %43 = vsyncpa [#allocation4], 1 }

</bundles_post_ra>
